<compile_context>
chip_gen: v6e
topology: v6e:2x2x1
jax: 0.10.0
libtpu: 0.0.40
codegen_flags: <defaults>
</compile_context>

<pallas_src>
import functools

import jax
import jax.numpy as jnp
from jax.experimental import pallas as pl
from jax.experimental.pallas import tpu as pltpu


def _linear_readout_kernel(x_ref, w_ref, *rest, horizon, out_size, has_bias):
    # x_ref: [BT, TN, K]   last-time-step rows (BT batches, TN-node tile)
    # w_ref: [K, HC]       resident weights (HC = horizon * out_size)
    # b_ref: [1, HC]       resident bias (optional)
    # o_ref: [BT, horizon, TN, out_size]
    if has_bias:
        b_ref, o_ref = rest
    else:
        (o_ref,) = rest
        b_ref = None

    bt, tn, k = x_ref.shape
    hc = horizon * out_size

    # Merge (BT, TN) -> M rows. Free sublane merge: wrapper guarantees
    # tn % 8 == 0 whenever bt > 1.
    x = x_ref[...].reshape(bt * tn, k)
    acc = jnp.dot(x, w_ref[...], preferred_element_type=jnp.float32)
    if has_bias:
        acc = acc + b_ref[...].astype(jnp.float32)
    acc = acc.reshape(bt, tn, hc).astype(o_ref.dtype)

    # Fused 'b n (h c) -> b h n c': the Linear output columns are already
    # horizon-major, so the rearrange is just static lane slices per horizon.
    for hi in range(horizon):
        o_ref[:, hi, :, :] = acc[:, :, hi * out_size:(hi + 1) * out_size]


def linear_readout(h, weight, bias=None, *, output_size, horizon,
                   max_rows=8192, vmem_budget_bytes=8 * 1024 * 1024):
    """Pallas implementation of tsl LinearReadout.forward.

    Args:
      h:      [b, t, n, f] or [b, n, f]
      weight: [horizon * output_size, f]   (PyTorch nn.Linear layout)
      bias:   [horizon * output_size] or None
    Returns:
      [b, horizon, n, output_size]
    """
    if h.ndim == 3:
        h = h[:, None]                       # [b, 1, n, f] — uniform 4-D path
    b, t, n, f = h.shape
    c = output_size
    hc = horizon * c
    assert weight.shape == (hc, f), weight.shape

    # NOTE: for a real model pre-transpose/reshape the parameters once at setup
    # time (these are tiny ops and constant-fold for parameters under jit).
    w = weight.T                             # [f, hc]
    has_bias = bias is not None
    if has_bias:
        b2 = bias.reshape(1, hc)

    # ---- Tile selection ------------------------------------------------------
    # Keep the double-buffered activation/output tiles well inside the scoped
    # VMEM default on every generation (16 MiB v5e, 32 MiB v6e/v7x).
    bytes_per_row = 2 * 4 * (f + hc)         # double-buffered, f32 upper bound
    rows_budget = max(8, vmem_budget_bytes // max(bytes_per_row, 1))
    rows_budget = min(rows_budget, max_rows)

    if n <= rows_budget:
        tn = n                               # full node dim (always legal)
    else:
        tn = (rows_budget // 8) * 8          # multiple of 8 sublanes

    # Fold batches into each grid step (amortizes ~0.35 us/step overhead);
    # only when the in-kernel sublane merge is free (tn % 8 == 0).
    if tn % 8 == 0:
        bt = max(1, min(b, rows_budget // max(tn, 1)))
    else:
        bt = 1

    def _cdiv(a, d):
        return (a + d - 1) // d

    # Keep >= 2 grid steps along the 'parallel' axes when possible so both
    # v7x TensorCores get work (harmless on v5e/v6e).
    if _cdiv(b, bt) * _cdiv(n, tn) < 2 and b > 1:
        bt = _cdiv(b, 2)

    grid = (_cdiv(b, bt), _cdiv(n, tn))
    t_last = t - 1

    in_specs = [
        # Fused last-time-step selection: time block index pinned to t-1.
        pl.BlockSpec((bt, pl.Squeezed(), tn, f),
                     lambda bi, ni: (bi, t_last, ni, 0)),
        pl.BlockSpec((f, hc), lambda bi, ni: (0, 0)),     # resident W
    ]
    inputs = [h, w]
    if has_bias:
        in_specs.append(pl.BlockSpec((1, hc), lambda bi, ni: (0, 0)))
        inputs.append(b2)

    out_spec = pl.BlockSpec((bt, horizon, tn, c),
                            lambda bi, ni: (bi, 0, ni, 0))

    itemsize = h.dtype.itemsize
    cost = pl.CostEstimate(
        flops=2 * b * n * f * hc,
        transcendentals=0,
        bytes_accessed=(b * n * f + f * hc + hc + b * n * hc) * itemsize,
    )

    kernel = functools.partial(_linear_readout_kernel,
                               horizon=horizon, out_size=c, has_bias=has_bias)

    return pl.pallas_call(
        kernel,
        out_shape=jax.ShapeDtypeStruct((b, horizon, n, c), h.dtype),
        grid=grid,
        in_specs=in_specs,
        out_specs=out_spec,
        compiler_params=pltpu.CompilerParams(
            dimension_semantics=("parallel", "parallel")),
        cost_estimate=cost,
    )(*inputs)


def _reference(h, weight, bias, *, output_size, horizon):
    if h.ndim == 4:
        h = h[:, -1]
    y = jnp.einsum('bnf,of->bno', h, weight)
    if bias is not None:
        y = y + bias
    b, n, _ = h.shape
    y = y.reshape(b, n, horizon, output_size)
    return jnp.transpose(y, (0, 2, 1, 3))


if __name__ == "__main__":
    # Small synthetic config.
    batch, time, nodes = 2, 8, 16
    input_size, output_size, horizon = 32, 4, 3

    key = jax.random.PRNGKey(0)
    k_h, k_w, k_b = jax.random.split(key, 3)

    h = jax.random.normal(k_h, (batch, time, nodes, input_size),
                          dtype=jnp.float32)

    # Deterministic params (shapes match nn.Linear(input_size, output_size*horizon)).
    bound = 1.0 / (input_size ** 0.5)
    weight = jax.random.uniform(
        k_w, (output_size * horizon, input_size), minval=-bound, maxval=bound,
        dtype=jnp.float32)
    bias = jax.random.uniform(
        k_b, (output_size * horizon,), minval=-bound, maxval=bound,
        dtype=jnp.float32)

    out = linear_readout(h, weight, bias,
                         output_size=output_size, horizon=horizon)
    out = jax.block_until_ready(out)

    ref = _reference(h, weight, bias, output_size=output_size, horizon=horizon)
    assert out.shape == (batch, horizon, nodes, output_size), out.shape
    assert jnp.allclose(out, ref, atol=1e-5, rtol=1e-5), "mismatch vs reference"

    # Also exercise the no-bias / 3-D input path once.
    out2 = jax.block_until_ready(
        linear_readout(h[:, -1], weight, None,
                       output_size=output_size, horizon=horizon))
    ref2 = _reference(h[:, -1], weight, None,
                      output_size=output_size, horizon=horizon)
    assert jnp.allclose(out2, ref2, atol=1e-5, rtol=1e-5), "mismatch (no bias)"

    print("KERNEL_OK")
</pallas_src>

<mosaic_0001>
module attributes {stable_mosaic.version = 11 : i64} {
  func.func @_linear_readout_kernel(%arg0: i32, %arg1: i32, %arg2: memref<1x1x16x32xf32, #tpu.memory_space<vmem>>, %arg3: memref<32x12xf32, #tpu.memory_space<vmem>>, %arg4: memref<1x12xf32, #tpu.memory_space<vmem>>, %arg5: memref<1x3x16x4xf32, #tpu.memory_space<vmem>>) attributes {dimension_semantics = [#tpu.dimension_semantics<parallel>, #tpu.dimension_semantics<parallel>], iteration_bounds = array<i64: 2, 1>, scalar_prefetch = 0 : i64, scratch_operands = 0 : i64, tpu.core_type = #tpu.core_type<tc>, window_params = [{transform_indices = @transform_0, window_bounds = array<i64: 1, 1, 16, 32>}, {pipeline_mode = #tpu.pipeline_mode<synchronous>, transform_indices = @transform_1, window_bounds = array<i64: 32, 12>}, {pipeline_mode = #tpu.pipeline_mode<synchronous>, transform_indices = @transform_2, window_bounds = array<i64: 1, 12>}, {transform_indices = @transform_3, window_bounds = array<i64: 1, 3, 16, 4>}]} {
    %c0 = arith.constant 0 : index
    %c0_0 = arith.constant 0 : index
    %c0_1 = arith.constant 0 : index
    %c0_2 = arith.constant 0 : index
    %0 = vector.load %arg2[%c0, %c0_0, %c0_1, %c0_2] : memref<1x1x16x32xf32, #tpu.memory_space<vmem>>, vector<1x1x16x32xf32>
    %1 = vector.shape_cast %0 : vector<1x1x16x32xf32> to vector<1x16x32xf32>
    %2 = vector.shape_cast %1 : vector<1x16x32xf32> to vector<16x32xf32>
    %c0_3 = arith.constant 0 : index
    %c0_4 = arith.constant 0 : index
    %3 = vector.load %arg3[%c0_3, %c0_4] : memref<32x12xf32, #tpu.memory_space<vmem>>, vector<32x12xf32>
    %cst = arith.constant dense<0.000000e+00> : vector<16x12xf32>
    %4 = tpu.matmul %2, %3, %cst {dimension_numbers = #tpu.dot_dimension_numbers<[1], [0], [0], [1], [0, 0, 1, 1], [], []>} : vector<16x32xf32>, vector<32x12xf32>, vector<16x12xf32> -> vector<16x12xf32>
    %c0_5 = arith.constant 0 : index
    %c0_6 = arith.constant 0 : index
    %5 = vector.load %arg4[%c0_5, %c0_6] : memref<1x12xf32, #tpu.memory_space<vmem>>, vector<1x12xf32>
    %6 = vector.broadcast %5 : vector<1x12xf32> to vector<16x12xf32>
    %7 = arith.addf %4, %6 : vector<16x12xf32>
    %8 = vector.shape_cast %7 : vector<16x12xf32> to vector<1x16x12xf32>
    %9 = vector.extract_strided_slice %8 {offsets = [0, 0, 0], sizes = [1, 16, 4], strides = [1, 1, 1]} : vector<1x16x12xf32> to vector<1x16x4xf32>
    %c0_7 = arith.constant 0 : index
    %c0_8 = arith.constant 0 : index
    %c0_9 = arith.constant 0 : index
    %c0_10 = arith.constant 0 : index
    %10 = vector.load %arg5[%c0_7, %c0_8, %c0_9, %c0_10] : memref<1x3x16x4xf32, #tpu.memory_space<vmem>>, vector<1x1x16x4xf32>
    %11 = vector.shape_cast %10 : vector<1x1x16x4xf32> to vector<1x16x4xf32>
    %12 = vector.shape_cast %9 : vector<1x16x4xf32> to vector<1x1x16x4xf32>
    tpu.vector_store %arg5[%c0_7, %c0_8, %c0_9, %c0_10], %12 {strides = array<i32>} : memref<1x3x16x4xf32, #tpu.memory_space<vmem>>, vector<1x1x16x4xf32>,
    %13 = vector.extract_strided_slice %8 {offsets = [0, 0, 4], sizes = [1, 16, 4], strides = [1, 1, 1]} : vector<1x16x12xf32> to vector<1x16x4xf32>
    %c0_11 = arith.constant 0 : index
    %c1 = arith.constant 1 : index
    %c0_12 = arith.constant 0 : index
    %c0_13 = arith.constant 0 : index
    %14 = vector.load %arg5[%c0_11, %c1, %c0_12, %c0_13] : memref<1x3x16x4xf32, #tpu.memory_space<vmem>>, vector<1x1x16x4xf32>
    %15 = vector.shape_cast %14 : vector<1x1x16x4xf32> to vector<1x16x4xf32>
    %16 = vector.shape_cast %13 : vector<1x16x4xf32> to vector<1x1x16x4xf32>
    tpu.vector_store %arg5[%c0_11, %c1, %c0_12, %c0_13], %16 {strides = array<i32>} : memref<1x3x16x4xf32, #tpu.memory_space<vmem>>, vector<1x1x16x4xf32>,
    %17 = vector.extract_strided_slice %8 {offsets = [0, 0, 8], sizes = [1, 16, 4], strides = [1, 1, 1]} : vector<1x16x12xf32> to vector<1x16x4xf32>
    %c0_14 = arith.constant 0 : index
    %c2 = arith.constant 2 : index
    %c0_15 = arith.constant 0 : index
    %c0_16 = arith.constant 0 : index
    %18 = vector.load %arg5[%c0_14, %c2, %c0_15, %c0_16] : memref<1x3x16x4xf32, #tpu.memory_space<vmem>>, vector<1x1x16x4xf32>
    %19 = vector.shape_cast %18 : vector<1x1x16x4xf32> to vector<1x16x4xf32>
    %20 = vector.shape_cast %17 : vector<1x16x4xf32> to vector<1x1x16x4xf32>
    tpu.vector_store %arg5[%c0_14, %c2, %c0_15, %c0_16], %20 {strides = array<i32>} : memref<1x3x16x4xf32, #tpu.memory_space<vmem>>, vector<1x1x16x4xf32>,
    return
  }
  func.func @transform_0(%arg0: i32, %arg1: i32) -> (i32, i32, i32, i32) {
    %c7_i32 = arith.constant 7 : i32
    %c0_i32 = arith.constant 0 : i32
    %c0_i32_0 = arith.constant 0 : i32
    return %arg0, %c7_i32, %arg1, %c0_i32 : i32, i32, i32, i32
  }
  func.func @transform_1(%arg0: i32, %arg1: i32) -> (i32, i32) {
    %c0_i32 = arith.constant 0 : i32
    %c0_i32_0 = arith.constant 0 : i32
    %c0_i32_1 = arith.constant 0 : i32
    return %c0_i32, %c0_i32_0 : i32, i32
  }
  func.func @transform_2(%arg0: i32, %arg1: i32) -> (i32, i32) {
    %c0_i32 = arith.constant 0 : i32
    %c0_i32_0 = arith.constant 0 : i32
    %c0_i32_1 = arith.constant 0 : i32
    return %c0_i32, %c0_i32_0 : i32, i32
  }
  func.func @transform_3(%arg0: i32, %arg1: i32) -> (i32, i32, i32, i32) {
    %c0_i32 = arith.constant 0 : i32
    %c0_i32_0 = arith.constant 0 : i32
    %c0_i32_1 = arith.constant 0 : i32
    return %arg0, %c0_i32, %arg1, %c0_i32_0 : i32, i32, i32, i32
  }
}

</mosaic_0001>

<bundles_post_ra>
// kernel: tpu_custom_call.1
= control target key start
LH: loop header
LB: loop body
LE: loop exit
PB: predicated region body
PF: predicated region fallthrough
CT: control target
= control target key end

     0   :  { %8 = vsyncpa [#allocation3], 0  ;;  %s761_s0 = inlined_call_operand.hbm [shape: f32[2,8,16,32], index: 0, kind: input, shape index: {}]   ;;  %s762_s1 = inlined_call_operand.vmem [shape: f32[32,12], index: 1, kind: input, shape index: {}]   ;;  %s763_s2 = inlined_call_operand.vmem [shape: f32[1,12], index: 2, kind: input, shape index: {}]   ;;  %s764_s3 = inlined_call_operand.vmem [shape: f32[2,3,16,4], index: 3, kind: output, shape index: {}]  }
   0x1   :  { %10 = vsyncpa [#allocation3 + $0x1], 0  ;;  %s637_s12 = smov 0   ;;  %s639_s13 = smov 0  }
   0x2   :  { %s641_s14 = smov 0   ;;  %s643_s15 = smov 0  }
   0x3   :  { %s645_s16 = smov 0   ;;  %s647_s17 = smov 0  }
   0x4 LB: > { %s434_s18 = sadd.s32 4294967295, %s610_s17   ;;  %s28_s19 = sadd.s32 1, %s606_s16  ;;  %s610_s17 = sphi %s647_s17, %s16_s17   ;;  %s606_s16 = sphi %s645_s16, %s772_s16   ;;  %s602_s15 = sphi %s643_s15, %s771_s15   ;;  %s598_s14 = sphi %s641_s14, %s770_s14   ;;  %s594_s13 = sphi %s639_s13, %s769_s13   ;;  %s590_s12 = sphi %s637_s12, %s768_s12  }
   0x5   : > { %p30_p0 = scmp.ge.s32.totalorder %s28_s19, 2  ;;  %s37_s20 = sadd.s32 1, %s598_s14 }
   0x6   : > { %p44_p1 = scmp.ne.s32.totalorder %s598_s14, %s594_s13  ;;  %p45_p2 = scmp.eq.s32.totalorder %s610_s17, 0 }
   0x7   : > { %s774_s19 = smov (%p30_p0, %s28_s19), 0  ;;  %p50_p4 = scmp.ne.s32.totalorder %s594_s13, %s590_s12 }
   0x8   : > { %p673_p3 = por %p45_p2, %p44_p1  ;;  %s32_s22 = ssub.s32 %s606_s16, %s774_s19 }
   0x9   : > { %p51_p5 = scmp.eq.s32.totalorder %s434_s18, 0  ;;  %p35_p6 = scmp.eq.s32.totalorder %s32_s22, 0 }
   0xa   : > { %p478_p8 = scmp.lt.s32.totalorder %s610_s17, 2  ;;  %s150_s25 = sand.u32 1, %s598_s14  }
   0xb   : > { %p680_p7 = por %p51_p5, %p50_p4  ;;  %s453_s26 = sshll.u32 %s606_s16, 11 }
   0xc   : > { %s686_s24 = scalar_select %p35_p6, %s598_s14, %s37_s20  }
   0xd   : > { %s438_s27 = sshll.u32 %s150_s25, 4  ;;  %s693_s30 = scalar_lea.hbm %s761_s0, %s453_s26 }
   0xe   : > { %s379_s4 = scalar_lea.hbm %s693_s30, 1792  ;;  %s154_s5 = scalar_lea.vmem [#allocation2], %s438_s27 }
   0xf   : > { %s164_s6 = sshll.u32 %s154_s5, 4  ;;  %p698_p9 = pnand %p478_p8, %p673_p3  ;;  %s165_s6 = int_to_ptr.vmem [resolvable:$true] %s164_s6 }
  0x10   : > { %p441_p10 = scmp.ge.s32.totalorder %s610_s17, 1  ;;  %s151_s8 = scalar_lea.sflag [#allocation3], %s150_s25 }
  0x11   : > { %p533_p11 = pneg %p698_p9  ;;  %s544_s9 = scalar_lea.vmem %s165_s6, 256 }
  0x12   : > { %p545_p12 = scmp.ne.s32.totalorder %s165_s6, %s544_s9  ;;  %s612_s10 = smov [#allocation2]  }
  0x13   : > { %s549_s11 = sshll.u32 %s612_s10, 4  ;;  %s550_s11 = int_to_ptr.vmem [resolvable:$false] %s549_s11 }
  0x14   : > { %p547_p13 = pnand %p545_p12, %p533_p11  ;;  %s551_s12 = scalar_lea.vmem %s550_s11, 512 }
  0x15   : > { %p552_p1 = scmp.lt.s32.totalorder %s165_s6, %s550_s11  ;;  %p553_p2 = scmp.lt.s32.totalorder %s551_s12, %s544_s9 }
  0x16   : > { %p548_p0 = pneg %p547_p13 }
  0x17   : > { %p554_p4 = por %p553_p2, %p552_p1 }
  0x19   : > { %p555_p3 = pnand %p554_p4, %p548_p0 }
  0x1b   : > { %558 = shalt.err (!%p555_p3)
}
  0x1c   : > { %s613_s18 = smov 128   ;;  %s614_s20 = smov 8  }
  0x1d   : > { %477 = dma.hbm_to_vmem [thread:$0]  (!%p698_p9), %s379_s4, 256, %s165_s6, %s151_s8, %s613_s18, %s613_s18, %s614_s20  }
  0x1e   : > { %p172_p5 = scmp.lt.s32.totalorder %s610_s17, 3 }
  0x20   : > { %p173_p6 = pnand %p441_p10, %p172_p5 }
  0x21   : > { %s178_s21 = sand.u32 (!%p173_p6), 1, %s594_s13  }
  0x22   : > { %176 = sbr.rel (%p173_p6) target bundleno = 366 (0x16e), region = 32  ;;  %s442_s22 = sshll.u32 (!%p173_p6), %s178_s21, 4 }
  0x23   : > { %s179_s25 = scalar_lea.sflag (!%p173_p6), [#allocation3], %s178_s21  ;;  %s182_s26 = scalar_lea.vmem (!%p173_p6), [#allocation2], %s442_s22 }
  0x27   : > { %585 = dma.done.wait (%p680_p7), %s179_s25, 256  }
  0x28   : > { %587 = vsyncadd (%p680_p7), %s179_s25, 4294967040  ;;  %vm233_vm0 = vcmask 261120   ;;  %v225_v0 = vld [vmem:[%s762_s1 + $0x18] sm:$0xff]  ;;  %v224_v1 = vld [vmem:[%s762_s1 + $0x10] sm:$0xff]  ;;  %p211_p7 = scmp.lt.s32.totalorder %s602_s15, 1  ;;  %vm315_vm1 = vcmask 31744  }
  0x29   : > { %460 = vmatprep.subr.mxu0 %v225_v0  ;;  %v220_v2 = vld [vmem:[%s182_s26] sm:$0xff]  ;;  %v223_v3 = vld [vmem:[%s762_s1 + $0x8] sm:$0xff]  ;;  %s615_s18 = smov 120  }
  0x2a   : > { %461 = vmatpush3.msra.mxu0 %v225_v0  ;;  %468 = vmatprep.mubr.msk.f32.mxu0 %vm233_vm0, %v220_v2  ;;  %v222_v4 = vld [vmem:[%s762_s1] sm:$0xff]  ;;  %v221_v5 = vld [vmem:[%s182_s26 + $0x8] sm:$0xff]  ;;  %s776_s15 = smov (!%p211_p7, %s602_s15), 1 }
  0x2b   : > { %462 = vmatprep.subr.mxu0 %v224_v1  ;;  %s471_s7 = smul.u32 48, %s776_s15  ;;  %v444_v6 = vld [vmem:[%s763_s2] ss:$0 sm:$0xff]  ;;  %s616_s15 = smov 124  }
  0x2c   : > { %463 = vmatpush3.msra.mxu0 %v224_v1 }
  0x2d   : > { %464 = vmatprep.subr.mxu0 %v223_v3  ;;  %s218_s12 = scalar_lea.vmem %s764_s3, %s471_s7 }
  0x2e   : > { %465 = vmatpush3.msra.mxu0 %v223_v3 }
  0x2f   : > { %466 = vmatprep.subr.mxu0 %v222_v4 }
  0x30   : > { %467 = vmatpush3.msra.mxu0 %v222_v4 }
  0x31   : > { %469 = vmatmul.mubr.msk.f32.vlgmr.msra.gmra.mxu0 %vm233_vm0, %v221_v5 }
  0xf1   : > { %v470_v7 = vpop.f32.mrf.mxu0 }
  0xf2   : > { %v312_v8 = vadd.f32 %v470_v7, %v444_v6 }
  0xf3   : > { %v306_v9 = vpop.f32.mrf.mxu0 }
  0xf4   : > { %317 = vst.msk [vmem:[%s218_s12 + $0x8] sm:$0xff] %vm315_vm1, %v312_v8  ;;  %v307_v10 = vadd.f32 %v444_v6, %v306_v9 }
  0xf6   : > { %316 = vst.msk [vmem:[%s218_s12] sm:$0xff] %vm315_vm1, %v307_v10  ;;  %329 = vrot.lane.b32.xlu1 %v307_v10, %s615_s18  ;;  %320 = vrot.lane.b32.xlu0 %v307_v10, %s616_s15 }
  0xfa   : > { %331 = vrot.lane.b32.xlu1 %v312_v8, %s615_s18  ;;  %322 = vrot.lane.b32.xlu0 %v312_v8, %s616_s15 }
 0x168   : > { %v330_v11 = vpop.permute.xlu1 %329  ;;  %v321_v12 = vpop.permute.xlu0 %320 }
 0x169   : > { %449 = vst.msk [vmem:[%s218_s12 + $0x20] sm:$0xff] %vm315_vm1, %v330_v11  ;;  %447 = vst.msk [vmem:[%s218_s12 + $0x10] sm:$0xff] %vm315_vm1, %v321_v12 }
 0x16c   : > { %v332_v13 = vpop.permute.xlu1 %331  ;;  %v323_v14 = vpop.permute.xlu0 %322 }
 0x16d   : > { %450 = vst.msk [vmem:[%s218_s12 + $0x28] sm:$0xff] %vm315_vm1, %v332_v13  ;;  %448 = vst.msk [vmem:[%s218_s12 + $0x18] sm:$0xff] %vm315_vm1, %v323_v14 }
 0x16e PF: > { %s16_s17 = sadd.s32 1, %s610_s17   ;;  %s768_s12 = smov %s594_s13 }
 0x16f   : > { %p13_p8 = scmp.ge.s32.totalorder %s16_s17, 4   ;;  %s769_s13 = smov %s598_s14 }
 0x170   : > { %s770_s14 = smov %s686_s24  ;;  %s771_s15 = smov %s606_s16 }
 0x171   : > { %s772_s16 = smov %s774_s19  ;;  %15 = sbr.rel (!%p13_p8) target bundleno = 4 (0x4), region = 74 }
 0x176   :  { %368 = vsyncpa [#allocation3], 1 }
 0x177   :  { %370 = vsyncpa [#allocation3 + $0x1], 1 }

</bundles_post_ra>
